<compile_context>
chip_gen: v5e
topology: v5e:2x2
jax: 0.10.0
libtpu: 0.0.40
codegen_flags: <defaults>
</compile_context>

<pallas_src>
from functools import partial, lru_cache

import jax
import jax.numpy as jnp
from jax import lax
from jax.experimental import pallas as pl
from jax.experimental.pallas import tpu as pltpu

_MASK_VALUE = -0.7 * float(jnp.finfo(jnp.float32).max)


# --------------------------- hardware-derived config -------------------------

@lru_cache(maxsize=None)
def _vmem_capacity_bytes():
    try:
        info = pltpu.get_tpu_info()
        for attr in ("vmem_capacity_bytes", "vmem_size_bytes", "vmem_bytes"):
            v = getattr(info, attr, None)
            if v:
                return int(v)
    except Exception:
        pass
    return 64 * 1024 * 1024  # conservative fallback (v7x-sized)


@lru_cache(maxsize=None)
def _vmem_limit_bytes():
    # ~75% of physical VMEM, capped: 96 MiB on v5e/v6e, 48 MiB on v7x-class parts.
    return int(min(_vmem_capacity_bytes() * 3 // 4, 100 * 1024 * 1024))


@lru_cache(maxsize=None)
def _default_tiles():
    if _vmem_capacity_bytes() >= 96 * 1024 * 1024:   # v5e / v6e: 128 MiB VMEM
        return dict(s_tile=512, q_tile=256, kv_tile=512)
    return dict(s_tile=256, q_tile=128, kv_tile=256)  # v7x: 64 MiB VMEM


def _pick_tile(n, preferred):
    """Largest tile <= preferred that divides n (kept a multiple of 8 when tiling)."""
    if n <= preferred:
        return n
    t = (preferred // 8) * 8
    while t > 8 and n % t != 0:
        t -= 8
    return t if (t > 0 and n % t == 0) else n


@lru_cache(maxsize=None)
def _roll_prev_shift(n):
    """Probe pltpu.roll's direction once.

    Returns the shift s such that pltpu.roll(x, s, axis=-1)[..., i] == x[..., i-1].
    """
    def _k(x_ref, o_ref):
        o_ref[...] = pltpu.roll(x_ref[...], shift=1, axis=1)

    x = jnp.broadcast_to(jnp.arange(128, dtype=jnp.float32)[None, :], (8, 128))
    y = pl.pallas_call(_k, out_shape=jax.ShapeDtypeStruct((8, 128), jnp.float32))(x)
    numpy_like = bool(y[0, 1] == 0.0)   # np.roll semantics: out[1] == x[0]
    return 1 if numpy_like else (n - 1)


# -------------------- fused QKV projection + RoPE + head split ---------------

def _qkv_rope_kernel(x_ref, wq_ref, wk_ref, wv_ref, bq_ref, bk_ref, bv_ref,
                     cos_ref, sin_ref, q_ref, k_ref, v_ref, *,
                     n_heads, dqk, dv, scale, prev_shift, compute_dtype):
    x = x_ref[0].astype(compute_dtype)                      # (ts, dim)
    ts = x.shape[0]
    n = n_heads * dqk
    next_shift = (n - prev_shift) % n

    def matmul(w_ref, b_ref):
        acc = lax.dot_general(x, w_ref[...].astype(compute_dtype),
                              (((1,), (0,)), ((), ())),
                              preferred_element_type=jnp.float32)
        return acc + b_ref[...].astype(jnp.float32)         # (ts, N) f32

    cos = cos_ref[...]                                      # (ts, H*Dqk) f32
    sin = sin_ref[...]
    lane = lax.broadcasted_iota(jnp.int32, (ts, n), 1)
    even = (lane % 2) == 0

    def rope(t):
        # Interleaved-pair rotation over the whole (ts, H*Dqk) slab.
        # nope lanes have cos=1 / sin=0 so the swizzled neighbour is ignored there.
        nxt = pltpu.roll(t, shift=next_shift, axis=1)        # t[i+1]
        prv = pltpu.roll(t, shift=prev_shift, axis=1)        # t[i-1]
        swapped = jnp.where(even, -nxt, prv)
        return t * cos + swapped * sin

    q = rope(matmul(wq_ref, bq_ref)) * scale                 # scale folded into q once
    k = rope(matmul(wk_ref, bk_ref))
    v = matmul(wv_ref, bv_ref)

    # Head split happens once here (per element), so the attention kernel sees
    # a clean head-separated, lane-dense layout.
    for h in range(n_heads):
        q_ref[0, h] = q[:, h * dqk:(h + 1) * dqk].astype(q_ref.dtype)
        k_ref[0, h] = k[:, h * dqk:(h + 1) * dqk].astype(k_ref.dtype)
        v_ref[0, h] = v[:, h * dv:(h + 1) * dv].astype(v_ref.dtype)


def qkv_rope_projection(x, wq, bq, wk, bk, wv, bv, cos_full, sin_full, *,
                        n_heads, dqk, dv, scale, out_dtype, compute_dtype,
                        s_tile=None, vmem_limit_bytes=None):
    """x (B,S,dim) -> q,k (B,H,S,Dqk) and v (B,H,S,Dv), RoPE applied, q pre-scaled."""
    B, S, dim = x.shape
    ts = _pick_tile(S, s_tile or _default_tiles()["s_tile"])
    vmem_limit_bytes = vmem_limit_bytes or _vmem_limit_bytes()
    prev_shift = _roll_prev_shift(n_heads * dqk)

    kernel = partial(_qkv_rope_kernel, n_heads=n_heads, dqk=dqk, dv=dv,
                     scale=scale, prev_shift=prev_shift,
                     compute_dtype=compute_dtype)

    def res_spec(shape):   # resident operand (same block every grid step)
        return pl.BlockSpec(shape, lambda b, si: (0,) * len(shape))

    Nq = n_heads * dqk
    Nv = n_heads * dv
    return pl.pallas_call(
        kernel,
        out_shape=(jax.ShapeDtypeStruct((B, n_heads, S, dqk), out_dtype),
                   jax.ShapeDtypeStruct((B, n_heads, S, dqk), out_dtype),
                   jax.ShapeDtypeStruct((B, n_heads, S, dv), out_dtype)),
        grid=(B, S // ts),
        in_specs=[
            pl.BlockSpec((1, ts, dim), lambda b, si: (b, si, 0)),
            res_spec((dim, Nq)), res_spec((dim, Nq)), res_spec((dim, Nv)),
            res_spec((1, Nq)), res_spec((1, Nq)), res_spec((1, Nv)),
            pl.BlockSpec((ts, Nq), lambda b, si: (si, 0)),
            pl.BlockSpec((ts, Nq), lambda b, si: (si, 0)),
        ],
        out_specs=(
            pl.BlockSpec((1, n_heads, ts, dqk), lambda b, si: (b, 0, si, 0)),
            pl.BlockSpec((1, n_heads, ts, dqk), lambda b, si: (b, 0, si, 0)),
            pl.BlockSpec((1, n_heads, ts, dv), lambda b, si: (b, 0, si, 0)),
        ),
        compiler_params=pltpu.CompilerParams(
            dimension_semantics=("parallel", "parallel"),
            vmem_limit_bytes=vmem_limit_bytes),
    )(x, wq, wk, wv, bq, bk, bv, cos_full, sin_full)


# ----------------------------- flash attention --------------------------------

def _flash_attn_kernel(q_ref, k_ref, v_ref, o_ref, m_sc, l_sc, acc_sc, *,
                       tq, tk, causal):
    ki = pl.program_id(3)

    @pl.when(ki == 0)
    def _init():
        m_sc[...] = jnp.full(m_sc.shape, -jnp.inf, m_sc.dtype)
        l_sc[...] = jnp.zeros(l_sc.shape, l_sc.dtype)
        acc_sc[...] = jnp.zeros(acc_sc.shape, acc_sc.dtype)

    def body(apply_mask, q_start, k_start):
        q = q_ref[0, 0]                                      # (tq, Dqk), pre-scaled
        k = k_ref[0, 0]
        v = v_ref[0, 0]
        s = lax.dot_general(q, k, (((1,), (1,)), ((), ())),
                            preferred_element_type=jnp.float32)   # (tq, tk) f32
        if apply_mask:
            q_pos = q_start + lax.broadcasted_iota(jnp.int32, (tq, tk), 0)
            k_pos = k_start + lax.broadcasted_iota(jnp.int32, (tq, tk), 1)
            s = jnp.where(k_pos <= q_pos, s, _MASK_VALUE)

        m_prev = m_sc[...]                                   # (tq, 1) f32
        m_new = jnp.maximum(m_prev, jnp.max(s, axis=-1, keepdims=True))
        alpha = jnp.exp(m_prev - m_new)
        p = jnp.exp(s - m_new)                               # f32 softmax stats
        l_sc[...] = alpha * l_sc[...] + jnp.sum(p, axis=-1, keepdims=True)
        acc_sc[...] = alpha * acc_sc[...] + lax.dot_general(
            p.astype(v.dtype), v, (((1,), (0,)), ((), ())),
            preferred_element_type=jnp.float32)
        m_sc[...] = m_new

    if causal:
        qi = pl.program_id(2)
        q_start = qi * tq
        k_start = ki * tk
        fully_visible = k_start + tk <= q_start + 1
        on_diag = jnp.logical_and(k_start + tk > q_start + 1,
                                  k_start <= q_start + (tq - 1))

        @pl.when(fully_visible)
        def _fast():                  # below the diagonal -> no mask work at all
            body(False, q_start, k_start)

        @pl.when(on_diag)
        def _masked():                # only the diagonal-straddling tile builds a mask
            body(True, q_start, k_start)
        # tiles entirely above the diagonal are skipped (and their DMA is elided
        # by the clamped kv index_map in the wrapper).
    else:
        body(False, 0, 0)

    @pl.when(ki == pl.num_programs(3) - 1)
    def _finalize():
        inv_l = pl.reciprocal(l_sc[...], approx=True)        # EUP slot
        o_ref[0, 0] = (acc_sc[...] * inv_l).astype(o_ref.dtype)


def flash_attention(q4, k4, v4, *, causal=True, q_tile=None, kv_tile=None,
                    vmem_limit_bytes=None):
    """q4/k4: (B, H, S, Dqk), v4: (B, H, S, Dv) -> (B, H, S, Dv)."""
    B, H, S, Dqk = q4.shape
    Dv = v4.shape[-1]
    tq = _pick_tile(S, q_tile or _default_tiles()["q_tile"])
    tk = _pick_tile(S, kv_tile or _default_tiles()["kv_tile"])
    vmem_limit_bytes = vmem_limit_bytes or _vmem_limit_bytes()

    kernel = partial(_flash_attn_kernel, tq=tq, tk=tk, causal=causal)

    q_map = lambda b, h, qi, ki: (b, h, qi, 0)
    if causal:
        # Clamp the kv index for fully-masked tiles so Pallas elides the re-copy
        # (skipped compute + skipped DMA ~ halves k/v HBM reads in the causal case).
        def kv_map(b, h, qi, ki):
            ki_max = (qi * tq + (tq - 1)) // tk
            return (b, h, jnp.minimum(ki, ki_max), 0)
    else:
        kv_map = lambda b, h, qi, ki: (b, h, ki, 0)

    return pl.pallas_call(
        kernel,
        out_shape=jax.ShapeDtypeStruct((B, H, S, Dv), q4.dtype),
        grid=(B, H, S // tq, S // tk),
        in_specs=[
            pl.BlockSpec((1, 1, tq, Dqk), q_map),
            pl.BlockSpec((1, 1, tk, Dqk), kv_map),
            pl.BlockSpec((1, 1, tk, Dv), kv_map),
        ],
        out_specs=pl.BlockSpec((1, 1, tq, Dv), q_map),
        scratch_shapes=[
            pltpu.VMEM((tq, 1), jnp.float32),      # running max
            pltpu.VMEM((tq, 1), jnp.float32),      # running denom
            pltpu.VMEM((tq, Dv), jnp.float32),     # output accumulator
        ],
        compiler_params=pltpu.CompilerParams(
            dimension_semantics=("parallel", "parallel", "parallel", "arbitrary"),
            vmem_limit_bytes=vmem_limit_bytes),
    )(q4, k4, v4)


# ------------------- output projection (head-reduction fused) ----------------

def _out_proj_kernel(o_ref, wo_ref, bo_ref, out_ref, acc_ref, *, compute_dtype):
    h = pl.program_id(2)

    @pl.when(h == 0)
    def _init():
        acc_ref[...] = jnp.zeros(acc_ref.shape, acc_ref.dtype)

    acc_ref[...] += lax.dot_general(
        o_ref[0, 0].astype(compute_dtype), wo_ref[0].astype(compute_dtype),
        (((1,), (0,)), ((), ())), preferred_element_type=jnp.float32)

    @pl.when(h == pl.num_programs(2) - 1)
    def _finalize():
        out_ref[0] = (acc_ref[...] + bo_ref[...].astype(jnp.float32)).astype(out_ref.dtype)


def out_projection(o4, wo, bo, *, compute_dtype, out_dtype, s_tile=None,
                   vmem_limit_bytes=None):
    """o4 (B,H,S,Dv) x wo (H*Dv, dim) + bo (1, dim) -> (B, S, dim).

    Consumes the head-separated layout directly (reduction over heads on a grid
    axis), so no transpose back to (B,S,H*Dv) is needed.
    """
    B, H, S, Dv = o4.shape
    dim = wo.shape[-1]
    wo3 = wo.reshape(H, Dv, dim)       # free view
    ts = _pick_tile(S, s_tile or _default_tiles()["s_tile"])
    vmem_limit_bytes = vmem_limit_bytes or _vmem_limit_bytes()

    kernel = partial(_out_proj_kernel, compute_dtype=compute_dtype)
    return pl.pallas_call(
        kernel,
        out_shape=jax.ShapeDtypeStruct((B, S, dim), out_dtype),
        grid=(B, S // ts, H),
        in_specs=[
            pl.BlockSpec((1, 1, ts, Dv), lambda b, si, h: (b, h, si, 0)),
            pl.BlockSpec((1, Dv, dim), lambda b, si, h: (h, 0, 0)),
            pl.BlockSpec((1, dim), lambda b, si, h: (0, 0)),
        ],
        out_specs=pl.BlockSpec((1, ts, dim), lambda b, si, h: (b, si, 0)),
        scratch_shapes=[pltpu.VMEM((ts, dim), jnp.float32)],
        compiler_params=pltpu.CompilerParams(
            dimension_semantics=("parallel", "parallel", "arbitrary"),
            vmem_limit_bytes=vmem_limit_bytes),
    )(o4, wo3, bo)


# ------------------------------ forward wrapper -------------------------------

def mla_forward(params, x, freqs_cos, freqs_sin, cfg, *, causal=True,
                compute_dtype=jnp.bfloat16, io_dtype=jnp.bfloat16):
    B, S, dim = x.shape
    H = cfg["n_heads"]
    Dn = cfg["qk_nope_head_dim"]
    Dr = cfg["qk_rope_head_dim"]
    Dqk = Dn + Dr
    Dv = cfg["v_head_dim"]
    scale = Dqk ** (-0.5)
    assert Dn % 2 == 0 and Dr % 2 == 0, "fused RoPE assumes even nope/rope dims"

    # Weights in bf16 in HBM (halves weight DMA); biases stay f32 (tiny, added to f32 acc).
    wq = params["wq"].astype(io_dtype)
    wk = params["wk"].astype(io_dtype)
    wv = params["wv"].astype(io_dtype)
    wo = params["wo"].astype(io_dtype)

    # cos/sin tables over the full H*Dqk lane layout: cos=1 / sin=0 on nope lanes,
    # interleaved (each rope angle repeated across its pair) on rope lanes.
    cos_i = jnp.repeat(freqs_cos.astype(jnp.float32), 2, axis=-1)   # (S, Dr)
    sin_i = jnp.repeat(freqs_sin.astype(jnp.float32), 2, axis=-1)
    cos_head = jnp.concatenate([jnp.ones((S, Dn), jnp.float32), cos_i], axis=-1)
    sin_head = jnp.concatenate([jnp.zeros((S, Dn), jnp.float32), sin_i], axis=-1)
    cos_full = jnp.tile(cos_head, (1, H))                           # (S, H*Dqk)
    sin_full = jnp.tile(sin_head, (1, H))

    # Fused QKV projection + RoPE + softmax scale + head split (bf16 outputs).
    q4, k4, v4 = qkv_rope_projection(
        x, wq, params["bq"], wk, params["bk"], wv, params["bv"],
        cos_full, sin_full, n_heads=H, dqk=Dqk, dv=Dv, scale=scale,
        out_dtype=io_dtype, compute_dtype=compute_dtype)

    # Flash attention over (B, H, S, D) with causal tile skipping + DMA elision.
    o4 = flash_attention(q4, k4, v4, causal=causal)

    # Output projection fused with the head reduction -> (B, S, dim).
    return out_projection(o4, wo, params["bo"], compute_dtype=compute_dtype,
                          out_dtype=x.dtype)


# --------------------------------- reference ----------------------------------

def _apply_rotary_emb_ref(x, cos_i, sin_i):
    """Interleaved-pair rotary (== torch.view_as_complex semantics)."""
    B, S, H, Dr = x.shape
    xp = x.reshape(B, S, H, Dr // 2, 2)
    swapped = jnp.stack([-xp[..., 1], xp[..., 0]], axis=-1).reshape(B, S, H, Dr)
    return x * cos_i[None, :, None, :] + swapped * sin_i[None, :, None, :]


def mla_reference(params, x, freqs_cos, freqs_sin, cfg, *, causal=True):
    """Pure-JAX f32 reference mirroring the PyTorch forward exactly."""
    B, S, dim = x.shape
    H = cfg["n_heads"]
    Dn = cfg["qk_nope_head_dim"]
    Dr = cfg["qk_rope_head_dim"]
    Dqk = Dn + Dr
    Dv = cfg["v_head_dim"]
    scale = Dqk ** (-0.5)

    x2d = x.reshape(B * S, dim)
    q = (x2d @ params["wq"] + params["bq"]).reshape(B, S, H, Dqk)
    k = (x2d @ params["wk"] + params["bk"]).reshape(B, S, H, Dqk)
    v = (x2d @ params["wv"] + params["bv"]).reshape(B, S, H, Dv)

    cos_i = jnp.repeat(freqs_cos, 2, axis=-1)
    sin_i = jnp.repeat(freqs_sin, 2, axis=-1)
    q = jnp.concatenate(
        [q[..., :Dn], _apply_rotary_emb_ref(q[..., Dn:], cos_i, sin_i)], axis=-1)
    k = jnp.concatenate(
        [k[..., :Dn], _apply_rotary_emb_ref(k[..., Dn:], cos_i, sin_i)], axis=-1)

    scores = jnp.einsum("bshd,bthd->bsht", q, k) * scale
    if causal:
        mask = jnp.where(jnp.arange(S)[:, None] >= jnp.arange(S)[None, :],
                         0.0, -jnp.inf).astype(jnp.float32)
        scores = scores + mask[None, :, None, :]
    p = jax.nn.softmax(scores.astype(jnp.float32), axis=-1).astype(x.dtype)
    o = jnp.einsum("bsht,bthd->bshd", p, v)
    out = o.reshape(B * S, H * Dv) @ params["wo"] + params["bo"]
    return out.reshape(B, S, dim)


# ----------------------------------- main --------------------------------------

if __name__ == "__main__":
    cfg = dict(
        dim=64,
        n_heads=2,
        qk_nope_head_dim=32,
        qk_rope_head_dim=32,
        v_head_dim=64,
    )
    B, S = 2, 16
    dim = cfg["dim"]
    H = cfg["n_heads"]
    Dqk = cfg["qk_nope_head_dim"] + cfg["qk_rope_head_dim"]
    Dv = cfg["v_head_dim"]
    Dr = cfg["qk_rope_head_dim"]

    key = jax.random.PRNGKey(0)
    kx, kq, kk, kv, ko, kbq, kbk, kbv, kbo = jax.random.split(key, 9)

    # Weights stored as (in_features, out_features) == PyTorch weight.T
    params = {
        "wq": 0.05 * jax.random.normal(kq, (dim, H * Dqk), jnp.float32),
        "bq": 0.05 * jax.random.normal(kbq, (1, H * Dqk), jnp.float32),
        "wk": 0.05 * jax.random.normal(kk, (dim, H * Dqk), jnp.float32),
        "bk": 0.05 * jax.random.normal(kbk, (1, H * Dqk), jnp.float32),
        "wv": 0.05 * jax.random.normal(kv, (dim, H * Dv), jnp.float32),
        "bv": 0.05 * jax.random.normal(kbv, (1, H * Dv), jnp.float32),
        "wo": 0.05 * jax.random.normal(ko, (H * Dv, dim), jnp.float32),
        "bo": 0.05 * jax.random.normal(kbo, (1, dim), jnp.float32),
    }
    x = jax.random.normal(kx, (B, S, dim), jnp.float32)

    # freqs_cis equivalent (cos/sin of per-position angles over the rope pairs).
    inv_freq = 1.0 / (10000.0 ** (jnp.arange(0, Dr, 2, dtype=jnp.float32) / Dr))
    theta = jnp.arange(S, dtype=jnp.float32)[:, None] * inv_freq[None, :]
    freqs_cos = jnp.cos(theta)  # (S, Dr//2)
    freqs_sin = jnp.sin(theta)  # (S, Dr//2)

    out = mla_forward(params, x, freqs_cos, freqs_sin, cfg, causal=True,
                      compute_dtype=jnp.bfloat16, io_dtype=jnp.bfloat16)
    out = jax.block_until_ready(out)

    ref = mla_reference(params, x, freqs_cos, freqs_sin, cfg, causal=True)
    ref = jax.block_until_ready(ref)

    assert out.shape == (B, S, dim)
    assert bool(jnp.allclose(out, ref, atol=2e-2, rtol=2e-2)), "mismatch vs reference"

    print("KERNEL_OK")
</pallas_src>

<mosaic_0001>
module attributes {stable_mosaic.version = 11 : i64} {
  func.func @_k(%arg0: memref<8x128xf32, #tpu.memory_space<vmem>>, %arg1: memref<8x128xf32, #tpu.memory_space<vmem>>) attributes {dimension_semantics = [], scalar_prefetch = 0 : i64, scratch_operands = 0 : i64, tpu.core_type = #tpu.core_type<tc>} {
    %c0 = arith.constant 0 : index
    %c0_0 = arith.constant 0 : index
    %0 = vector.load %arg0[%c0, %c0_0] : memref<8x128xf32, #tpu.memory_space<vmem>>, vector<8x128xf32>
    %c1_i32 = arith.constant 1 : i32
    %1 = tpu.dynamic_rotate %0 by %c1_i32 dim 1 : vector<8x128xf32>, i32 -> vector<8x128xf32>
    %c0_1 = arith.constant 0 : index
    %c0_2 = arith.constant 0 : index
    %2 = vector.load %arg1[%c0_1, %c0_2] : memref<8x128xf32, #tpu.memory_space<vmem>>, vector<8x128xf32>
    tpu.vector_store %arg1[%c0_1, %c0_2], %1 {strides = array<i32>} : memref<8x128xf32, #tpu.memory_space<vmem>>, vector<8x128xf32>,
    return
  }
}

</mosaic_0001>

<bundles_post_ra>
// kernel: tpu_custom_call.1
= control target key start
LH: loop header
LB: loop body
LE: loop exit
PB: predicated region body
PF: predicated region fallthrough
CT: control target
= control target key end

     0   :  { %6 = vsyncpa [#allocation3], 0  ;;  %s118_s0 = inlined_call_operand.hbm [shape: f32[8,128], index: 0, kind: input, shape index: {}]   ;;  %s119_s1 = inlined_call_operand.hbm [shape: f32[8,128], index: 1, kind: output, shape index: {}]  }
   0x1   :  { %7 = vsyncpa [#allocation4], 0  ;;  %s13_s8 = sshll.u32 %s118_s0, 4  ;;  %s99_s9 = smov [#allocation2]   ;;  %s14_s8 = int_to_ptr.hbm [resolvable:$true] %s13_s8 }
   0x2   :  { %s15_s10 = sshll.u32 %s99_s9, 4  ;;  %s16_s10 = int_to_ptr.vmem [resolvable:$true] %s15_s10 }
   0x3   :  { %18 = dma.hbm_to_vmem [thread:$0]  %s14_s8, 128, %s16_s10, [#allocation3]  }
   0x4   :  { %95 = dma.done.wait [#allocation3], 128  }
   0x5   :  { %96 = vsyncadd [#allocation3], 4294967168  ;;  %v23_v0 = vld [vmem:[#allocation2] sm:$0xff]  ;;  %s100_s11 = smov 1   ;;  %s101_s12 = smov [#allocation5]  }
   0x6   :  { %24 = vrot.lane.b32.xlu0 %v23_v0, %s100_s11  ;;  %s32_s13 = sshll.u32 %s101_s12, 4  ;;  %s34_s16 = sshll.u32 %s119_s1, 4  ;;  %s33_s13 = int_to_ptr.vmem [resolvable:$true] %s32_s13  ;;  %s35_s16 = int_to_ptr.hbm [resolvable:$true] %s34_s16 }
  0x78   :  { %v25_v1 = vpop.permute.xlu0 %24 }
  0x79   :  { %26 = vst [vmem:[#allocation5] sm:$0xff] %v25_v1 }
  0x7a   :  { %37 = dma.vmem_to_hbm [thread:$0]  %s33_s13, 128, %s35_s16, [#allocation4]  }
  0x7b   :  { %97 = dma.done.wait [#allocation4], 128  }
  0x7c   :  { %98 = vsyncadd [#allocation4], 4294967168 }
  0x7d   :  { %42 = vsyncpa [#allocation3], 1 }
  0x7e   :  { %43 = vsyncpa [#allocation4], 1 }

</bundles_post_ra>
